<compile_context>
chip_gen: v5e
topology: v5e:2x2
jax: 0.10.0
libtpu: 0.0.40
codegen_flags: <defaults>
</compile_context>

<pallas_src>
import numpy as np
import jax
import jax.numpy as jnp
from jax.experimental import pallas as pl
from jax.experimental.pallas import tpu as pltpu


def _dwt2d_haar_kernel(x_ref, w_ref, ll_ref, lh_ref, hl_ref, hh_ref):
    """One grid step over a block of independent vertical row-pairs.

    x_ref : (bR, 2*W)  each row = [even_image_row | odd_image_row]
    w_ref : (W, W)     fused column filter, cols [0:W/2]=low, [W/2:W]=high, +/-0.5
    outs  : (bR, W/2)  LL, LH, HL, HH rows for the same row-pairs
    """
    w2 = ll_ref.shape[-1]
    w = 2 * w2

    xv = x_ref[...]
    even = xv[:, :w].astype(jnp.float32)
    odd = xv[:, w:].astype(jnp.float32)

    cd = w_ref.dtype                       # matmul operand dtype (f32 or bf16)
    t_lo = (even + odd).astype(cd)         # vertical low-pass  (unscaled)
    t_hi = (even - odd).astype(cd)         # vertical high-pass (unscaled)

    wc = w_ref[...]                        # (W, W) lane-dense column filter
    y_top = jnp.dot(t_lo, wc, preferred_element_type=jnp.float32)
    y_bot = jnp.dot(t_hi, wc, preferred_element_type=jnp.float32)

    ll_ref[...] = y_top[:, :w2].astype(ll_ref.dtype)
    lh_ref[...] = y_top[:, w2:].astype(lh_ref.dtype)
    hl_ref[...] = y_bot[:, :w2].astype(hl_ref.dtype)
    hh_ref[...] = y_bot[:, w2:].astype(hh_ref.dtype)


def _haar_col_matrix(w, dtype):
    """Fused decimated Haar column-analysis matrix with exact +/-0.5 entries.

    Columns 0..W/2-1 are the low-pass outputs, W/2..W-1 the high-pass ones.
    The 0.5 carries the full 2-D scale (row butterfly is unscaled), so the
    composed transform equals (1/sqrt(2))^2 of the reference exactly.
    """
    w2 = w // 2
    m = np.zeros((w, w), np.float32)
    for j in range(w2):
        m[2 * j, j] = 0.5
        m[2 * j + 1, j] = 0.5
        m[2 * j, w2 + j] = 0.5
        m[2 * j + 1, w2 + j] = -0.5
    return jnp.asarray(m, dtype=dtype)


def _pick_block_rows(total_rows, row_bytes,
                     target_bytes=4 << 20, split_threshold=1 << 20):
    """Row-pairs per grid step: ~4 MiB of input per step, sublane-aligned.

    Keeps at least 2 grid steps when there is enough work so the "parallel"
    axis can feed both TensorCores on v7x.  Remainder rows become a partial
    last block (row-pairs are independent; Pallas masks the padded writes).
    """
    if total_rows <= 8:
        return total_rows
    r = min(total_rows, max(8, target_bytes // max(row_bytes, 1)))
    if r >= total_rows and total_rows * row_bytes > split_threshold:
        r = (total_rows + 1) // 2
    r -= r % 8
    return max(r, 8)


def down_sampling_dwt(x):
    """Pallas equivalent of DownSamplingDWT.forward: returns (LL, LH, HL, HH, input)."""
    n, c, h, w = x.shape
    assert h % 2 == 0 and w % 2 == 0, "haar DWT needs even spatial dims"
    dtype = x.dtype
    w2 = w // 2
    np_rows = n * c * (h // 2)

    # Free, contiguous reshape: one row per vertical row-pair.
    x_pairs = x.reshape(np_rows, 2 * w)

    # Keep MXU operands in the input dtype for sub-f32 inputs (bf16-native MXU);
    # +/-0.5 filter entries are exact in bf16, accumulation is always f32.
    compute_dtype = jnp.float32 if jnp.dtype(dtype) == jnp.float32 else jnp.dtype(dtype)
    w_cat = _haar_col_matrix(w, compute_dtype)

    itemsize = jnp.dtype(dtype).itemsize
    row_bytes = 2 * w * itemsize
    b_rows = _pick_block_rows(np_rows, row_bytes)
    grid = (pl.cdiv(np_rows, b_rows),)

    in_specs = [
        pl.BlockSpec((b_rows, 2 * w), lambda i: (i, 0)),
        pl.BlockSpec((w, w), lambda i: (0, 0)),     # filter: DMA'd once
    ]
    out_spec = [pl.BlockSpec((b_rows, w2), lambda i: (i, 0)) for _ in range(4)]
    out_shape = tuple(jax.ShapeDtypeStruct((np_rows, w2), dtype) for _ in range(4))

    # VMEM budget: double-buffered input + 4 outputs + filter + f32 temporaries.
    c_itemsize = jnp.dtype(compute_dtype).itemsize
    in_blk = b_rows * 2 * w * itemsize
    out_blk = 4 * b_rows * w2 * itemsize
    filt = w * w * c_itemsize
    temps = 6 * b_rows * w * 4
    vmem_needed = 2 * (in_blk + out_blk + filt) + temps
    vmem_limit = int(min(max(vmem_needed + (8 << 20), 32 << 20), 48 << 20))

    ll, lh, hl, hh = pl.pallas_call(
        _dwt2d_haar_kernel,
        out_shape=out_shape,
        grid_spec=pltpu.PrefetchScalarGridSpec(
            num_scalar_prefetch=0,
            grid=grid,
            in_specs=in_specs,
            out_specs=out_spec,
        ),
        compiler_params=pltpu.CompilerParams(
            dimension_semantics=("parallel",),
            vmem_limit_bytes=vmem_limit,
        ),
    )(x_pairs, w_cat)

    h2 = h // 2
    ll = ll.reshape(n, c, h2, w2)
    lh = lh.reshape(n, c, h2, w2)
    hl = hl.reshape(n, c, h2, w2)
    hh = hh.reshape(n, c, h2, w2)
    return ll, lh, hl, hh, x


if __name__ == "__main__":
    key = jax.random.PRNGKey(0)
    N, C, H, W = 2, 4, 16, 16
    x = jax.random.normal(key, (N, C, H, W), dtype=jnp.float32)

    outs = jax.block_until_ready(down_sampling_dwt(x))
    LL, LH, HL, HH, passthrough = outs

    # Pure-JAX reference (haar subbands on 2x2 blocks).
    a = x[:, :, 0::2, 0::2]
    b = x[:, :, 0::2, 1::2]
    c_ = x[:, :, 1::2, 0::2]
    d = x[:, :, 1::2, 1::2]
    LL_ref = (a + b + c_ + d) * 0.5
    LH_ref = (a - b + c_ - d) * 0.5
    HL_ref = (a + b - c_ - d) * 0.5
    HH_ref = (a - b - c_ + d) * 0.5

    assert LL.shape == (N, C, H // 2, W // 2)
    assert LH.shape == HL.shape == HH.shape == (N, C, H // 2, W // 2)
    np.testing.assert_allclose(np.asarray(LL), np.asarray(LL_ref), atol=1e-5)
    np.testing.assert_allclose(np.asarray(LH), np.asarray(LH_ref), atol=1e-5)
    np.testing.assert_allclose(np.asarray(HL), np.asarray(HL_ref), atol=1e-5)
    np.testing.assert_allclose(np.asarray(HH), np.asarray(HH_ref), atol=1e-5)
    np.testing.assert_allclose(np.asarray(passthrough), np.asarray(x), atol=0)

    print("KERNEL_OK")
</pallas_src>

<mosaic_0001>
module attributes {stable_mosaic.version = 11 : i64} {
  func.func @_dwt2d_haar_kernel(%arg0: i32, %arg1: memref<64x32xf32, #tpu.memory_space<vmem>>, %arg2: memref<16x16xf32, #tpu.memory_space<vmem>>, %arg3: memref<64x8xf32, #tpu.memory_space<vmem>>, %arg4: memref<64x8xf32, #tpu.memory_space<vmem>>, %arg5: memref<64x8xf32, #tpu.memory_space<vmem>>, %arg6: memref<64x8xf32, #tpu.memory_space<vmem>>) attributes {dimension_semantics = [#tpu.dimension_semantics<parallel>], iteration_bounds = array<i64: 1>, scalar_prefetch = 0 : i64, scratch_operands = 0 : i64, tpu.core_type = #tpu.core_type<tc>, window_params = [{transform_indices = @transform_0, window_bounds = array<i64: 64, 32>}, {pipeline_mode = #tpu.pipeline_mode<synchronous>, transform_indices = @transform_1, window_bounds = array<i64: 16, 16>}, {transform_indices = @transform_2, window_bounds = array<i64: 64, 8>}, {transform_indices = @transform_3, window_bounds = array<i64: 64, 8>}, {transform_indices = @transform_4, window_bounds = array<i64: 64, 8>}, {transform_indices = @transform_5, window_bounds = array<i64: 64, 8>}]} {
    %c0 = arith.constant 0 : index
    %c0_0 = arith.constant 0 : index
    %0 = vector.load %arg1[%c0, %c0_0] : memref<64x32xf32, #tpu.memory_space<vmem>>, vector<64x32xf32>
    %1 = vector.extract_strided_slice %0 {offsets = [0, 0], sizes = [64, 16], strides = [1, 1]} : vector<64x32xf32> to vector<64x16xf32>
    %2 = vector.extract_strided_slice %0 {offsets = [0, 16], sizes = [64, 16], strides = [1, 1]} : vector<64x32xf32> to vector<64x16xf32>
    %3 = arith.addf %1, %2 : vector<64x16xf32>
    %4 = arith.subf %1, %2 : vector<64x16xf32>
    %c0_1 = arith.constant 0 : index
    %c0_2 = arith.constant 0 : index
    %5 = vector.load %arg2[%c0_1, %c0_2] : memref<16x16xf32, #tpu.memory_space<vmem>>, vector<16x16xf32>
    %cst = arith.constant dense<0.000000e+00> : vector<64x16xf32>
    %6 = tpu.matmul %3, %5, %cst {dimension_numbers = #tpu.dot_dimension_numbers<[1], [0], [0], [1], [0, 0, 1, 1], [], []>} : vector<64x16xf32>, vector<16x16xf32>, vector<64x16xf32> -> vector<64x16xf32>
    %cst_3 = arith.constant dense<0.000000e+00> : vector<64x16xf32>
    %7 = tpu.matmul %4, %5, %cst_3 {dimension_numbers = #tpu.dot_dimension_numbers<[1], [0], [0], [1], [0, 0, 1, 1], [], []>} : vector<64x16xf32>, vector<16x16xf32>, vector<64x16xf32> -> vector<64x16xf32>
    %8 = vector.extract_strided_slice %6 {offsets = [0, 0], sizes = [64, 8], strides = [1, 1]} : vector<64x16xf32> to vector<64x8xf32>
    %c0_4 = arith.constant 0 : index
    %c0_5 = arith.constant 0 : index
    %9 = vector.load %arg3[%c0_4, %c0_5] : memref<64x8xf32, #tpu.memory_space<vmem>>, vector<64x8xf32>
    tpu.vector_store %arg3[%c0_4, %c0_5], %8 {strides = array<i32>} : memref<64x8xf32, #tpu.memory_space<vmem>>, vector<64x8xf32>,
    %10 = vector.extract_strided_slice %6 {offsets = [0, 8], sizes = [64, 8], strides = [1, 1]} : vector<64x16xf32> to vector<64x8xf32>
    %c0_6 = arith.constant 0 : index
    %c0_7 = arith.constant 0 : index
    %11 = vector.load %arg4[%c0_6, %c0_7] : memref<64x8xf32, #tpu.memory_space<vmem>>, vector<64x8xf32>
    tpu.vector_store %arg4[%c0_6, %c0_7], %10 {strides = array<i32>} : memref<64x8xf32, #tpu.memory_space<vmem>>, vector<64x8xf32>,
    %12 = vector.extract_strided_slice %7 {offsets = [0, 0], sizes = [64, 8], strides = [1, 1]} : vector<64x16xf32> to vector<64x8xf32>
    %c0_8 = arith.constant 0 : index
    %c0_9 = arith.constant 0 : index
    %13 = vector.load %arg5[%c0_8, %c0_9] : memref<64x8xf32, #tpu.memory_space<vmem>>, vector<64x8xf32>
    tpu.vector_store %arg5[%c0_8, %c0_9], %12 {strides = array<i32>} : memref<64x8xf32, #tpu.memory_space<vmem>>, vector<64x8xf32>,
    %14 = vector.extract_strided_slice %7 {offsets = [0, 8], sizes = [64, 8], strides = [1, 1]} : vector<64x16xf32> to vector<64x8xf32>
    %c0_10 = arith.constant 0 : index
    %c0_11 = arith.constant 0 : index
    %15 = vector.load %arg6[%c0_10, %c0_11] : memref<64x8xf32, #tpu.memory_space<vmem>>, vector<64x8xf32>
    tpu.vector_store %arg6[%c0_10, %c0_11], %14 {strides = array<i32>} : memref<64x8xf32, #tpu.memory_space<vmem>>, vector<64x8xf32>,
    return
  }
  func.func @transform_0(%arg0: i32) -> (i32, i32) {
    %c0_i32 = arith.constant 0 : i32
    %c0_i32_0 = arith.constant 0 : i32
    return %arg0, %c0_i32 : i32, i32
  }
  func.func @transform_1(%arg0: i32) -> (i32, i32) {
    %c0_i32 = arith.constant 0 : i32
    %c0_i32_0 = arith.constant 0 : i32
    %c0_i32_1 = arith.constant 0 : i32
    return %c0_i32, %c0_i32_0 : i32, i32
  }
  func.func @transform_2(%arg0: i32) -> (i32, i32) {
    %c0_i32 = arith.constant 0 : i32
    %c0_i32_0 = arith.constant 0 : i32
    return %arg0, %c0_i32 : i32, i32
  }
  func.func @transform_3(%arg0: i32) -> (i32, i32) {
    %c0_i32 = arith.constant 0 : i32
    %c0_i32_0 = arith.constant 0 : i32
    return %arg0, %c0_i32 : i32, i32
  }
  func.func @transform_4(%arg0: i32) -> (i32, i32) {
    %c0_i32 = arith.constant 0 : i32
    %c0_i32_0 = arith.constant 0 : i32
    return %arg0, %c0_i32 : i32, i32
  }
  func.func @transform_5(%arg0: i32) -> (i32, i32) {
    %c0_i32 = arith.constant 0 : i32
    %c0_i32_0 = arith.constant 0 : i32
    return %arg0, %c0_i32 : i32, i32
  }
}

</mosaic_0001>

<bundles_post_ra>
// kernel: tpu_custom_call.1
= control target key start
LH: loop header
LB: loop body
LE: loop exit
PB: predicated region body
PF: predicated region fallthrough
CT: control target
= control target key end

     0   :  { %s339_s22 = smov 112   ;;  %vm73_vm0 = vcmask 130048   ;;  %vm204_vm1 = vcmask 64512   ;;  %s340_s14 = smov 120   ;;  %s561_s0 = inlined_call_operand.vmem [shape: f32[64,32], index: 0, kind: input, shape index: {}]   ;;  %s562_s1 = inlined_call_operand.vmem [shape: f32[16,16], index: 1, kind: input, shape index: {}]   ;;  %s563_s2 = inlined_call_operand.vmem [shape: f32[64,8], index: 2, kind: output, shape index: {0}]   ;;  %s564_s4 = inlined_call_operand.vmem [shape: f32[64,8], index: 4, kind: output, shape index: {2}]   ;;  %s565_s3 = inlined_call_operand.vmem [shape: f32[64,8], index: 3, kind: output, shape index: {1}]   ;;  %s566_s5 = inlined_call_operand.vmem [shape: f32[64,8], index: 5, kind: output, shape index: {3}]  }
   0x1   :  { %v19_v0 = vld [vmem:[%s561_s0 + $0x20] sm:$0xff]  ;;  %v20_v1 = vld [vmem:[%s561_s0 + $0x28] sm:$0xff]  ;;  %v21_v2 = vld [vmem:[%s561_s0 + $0x30] sm:$0xff] }
   0x2   :  { %39 = vrot.lane.b32.xlu0 %v19_v0, %s339_s22  ;;  %41 = vrot.lane.b32.xlu1 %v20_v1, %s339_s22  ;;  %v72_v3 = vld [vmem:[%s562_s1 + $0x8] sm:$0xff]  ;;  %v15_v4 = vld [vmem:[%s561_s0] sm:$0xff] }
   0x3   :  { %43 = vrot.lane.b32.xlu2 %v21_v2, %s339_s22  ;;  %333 = vmatpush.msra.mxu2 %v72_v3  ;;  %v16_v5 = vld [vmem:[%s561_s0 + $0x8] sm:$0xff]  ;;  %v17_v6 = vld [vmem:[%s561_s0 + $0x10] sm:$0xff]  ;;  %v22_v7 = vld [vmem:[%s561_s0 + $0x38] sm:$0xff] }
   0x4   :  { %335 = vmatpush.msra.mxu3 %v72_v3  ;;  %112 = vmatpush.msra.mxu0 %v72_v3  ;;  %v18_v8 = vld [vmem:[%s561_s0 + $0x18] sm:$0xff]  ;;  %v71_v9 = vld [vmem:[%s562_s1] sm:$0xff] }
   0x5   :  { %177 = vmatpush.msra.mxu1 %v72_v3  ;;  %334 = vmatpush.msra.mxu2 %v71_v9 }
   0x6   :  { %336 = vmatpush.msra.mxu3 %v71_v9  ;;  %113 = vmatpush.msra.mxu0 %v71_v9 }
   0x7   :  { %178 = vmatpush.msra.mxu1 %v71_v9 }
   0xa   :  { %31 = vrot.lane.b32.xlu0 %v15_v4, %s339_s22  ;;  %33 = vrot.lane.b32.xlu1 %v16_v5, %s339_s22 }
   0xb   :  { %35 = vrot.lane.b32.xlu2 %v17_v6, %s339_s22 }
  0x12   :  { %45 = vrot.lane.b32.xlu0 %v22_v7, %s339_s22  ;;  %37 = vrot.lane.b32.xlu1 %v18_v8, %s339_s22 }
  0x5d   :  { %v44_v19 = vpop.permute.xlu2 %43 }
  0x5e   :  { %v61_v21 = vadd.f32 %v44_v19, %v21_v2  ;;  %v69_v23 = vsub.f32 %v21_v2, %v44_v19 }
  0x65   :  { %v36_v25 = vpop.permute.xlu2 %35 }
  0x66   :  { %v57_v27 = vadd.f32 %v36_v25, %v17_v6  ;;  %v65_v29 = vsub.f32 %v17_v6, %v36_v25 }
  0x74   :  { %v40_v10 = vpop.permute.xlu0 %39  ;;  %v42_v13 = vpop.permute.xlu1 %41 }
  0x75   :  { %v59_v11 = vadd.f32 %v40_v10, %v19_v0  ;;  %v67_v12 = vsub.f32 %v19_v0, %v40_v10  ;;  %v60_v14 = vadd.f32 %v42_v13, %v20_v1  ;;  %v68_v15 = vsub.f32 %v20_v1, %v42_v13 }
  0x77   :  { %321 = vmatmul.msk.f32.vlgmr.msra.gmra.mxu2 %vm73_vm0, %v59_v11  ;;  %329 = vmatmul.msk.f32.vlgmr.msra.gmra.mxu3 %vm73_vm0, %v67_v12 }
  0x7c   :  { %v32_v16 = vpop.permute.xlu0 %31  ;;  %v34_v20 = vpop.permute.xlu1 %33 }
  0x7d   :  { %v55_v17 = vadd.f32 %v32_v16, %v15_v4  ;;  %v63_v18 = vsub.f32 %v15_v4, %v32_v16  ;;  %v56_v22 = vadd.f32 %v34_v20, %v16_v5  ;;  %v64_v24 = vsub.f32 %v16_v5, %v34_v20 }
  0x7f   :  { %317 = vmatmul.msk.f32.vlgmr.msra.gmra.mxu0 %vm73_vm0, %v55_v17  ;;  %322 = vmatmul.msk.f32.gmra.mxu2 %vm73_vm0, %v60_v14 }
  0x80   :  { %325 = vmatmul.msk.f32.vlgmr.msra.gmra.mxu1 %vm73_vm0, %v63_v18  ;;  %330 = vmatmul.msk.f32.gmra.mxu3 %vm73_vm0, %v68_v15 }
  0x84   :  { %v46_v26 = vpop.permute.xlu0 %45  ;;  %v38_v31 = vpop.permute.xlu1 %37 }
  0x85   :  { %v62_v28 = vadd.f32 %v46_v26, %v22_v7  ;;  %v70_v30 = vsub.f32 %v22_v7, %v46_v26  ;;  %v58_v32 = vadd.f32 %v38_v31, %v18_v8  ;;  %v66_v33 = vsub.f32 %v18_v8, %v38_v31 }
  0x87   :  { %318 = vmatmul.msk.f32.gmra.mxu0 %vm73_vm0, %v56_v22  ;;  %323 = vmatmul.msk.f32.gmra.mxu2 %vm73_vm0, %v61_v21 }
  0x88   :  { %326 = vmatmul.msk.f32.gmra.mxu1 %vm73_vm0, %v64_v24  ;;  %331 = vmatmul.msk.f32.gmra.mxu3 %vm73_vm0, %v69_v23 }
  0x8f   :  { %319 = vmatmul.msk.f32.gmra.mxu0 %vm73_vm0, %v57_v27  ;;  %324 = vmatmul.msk.f32.gmra.mxu2 %vm73_vm0, %v62_v28 }
  0x90   :  { %327 = vmatmul.msk.f32.gmra.mxu1 %vm73_vm0, %v65_v29  ;;  %332 = vmatmul.msk.f32.gmra.mxu3 %vm73_vm0, %v70_v30 }
  0x97   :  { %320 = vmatmul.msk.f32.gmra.mxu0 %vm73_vm0, %v58_v32 }
  0x98   :  { %328 = vmatmul.msk.f32.gmra.mxu1 %vm73_vm0, %v66_v33 }
  0xfa   :  { %v127_v34 = vpop.f32.mrf.mxu2  ;;  %v192_v35 = vpop.f32.mrf.mxu3 }
  0xfb   :  { %209 = vst.msk [vmem:[%s563_s2 + $0x20] sm:$0xff] %vm204_vm1, %v127_v34  ;;  %229 = vrot.lane.b32.xlu0 %v127_v34, %s340_s14 }
  0xfc   :  { %257 = vst.msk [vmem:[%s564_s4 + $0x20] sm:$0xff] %vm204_vm1, %v192_v35  ;;  %v115_v36 = vpop.f32.mrf.mxu0 }
  0xfd   :  { %205 = vst.msk [vmem:[%s563_s2] sm:$0xff] %vm204_vm1, %v115_v36  ;;  %v180_v37 = vpop.f32.mrf.mxu1  ;;  %221 = vrot.lane.b32.xlu2 %v115_v36, %s340_s14 }
  0xfe   :  { %253 = vst.msk [vmem:[%s564_s4] sm:$0xff] %vm204_vm1, %v180_v37  ;;  %269 = vrot.lane.b32.xlu1 %v180_v37, %s340_s14 }
 0x102   :  { %v130_v38 = vpop.f32.mrf.mxu2 }
 0x103   :  { %210 = vst.msk [vmem:[%s563_s2 + $0x28] sm:$0xff] %vm204_vm1, %v130_v38  ;;  %v195_v39 = vpop.f32.mrf.mxu3 }
 0x104   :  { %258 = vst.msk [vmem:[%s564_s4 + $0x28] sm:$0xff] %vm204_vm1, %v195_v39  ;;  %v118_v40 = vpop.f32.mrf.mxu0 }
 0x105   :  { %206 = vst.msk [vmem:[%s563_s2 + $0x8] sm:$0xff] %vm204_vm1, %v118_v40  ;;  %v183_v41 = vpop.f32.mrf.mxu1  ;;  %277 = vrot.lane.b32.xlu2 %v192_v35, %s340_s14  ;;  %223 = vrot.lane.b32.xlu0 %v118_v40, %s340_s14 }
 0x106   :  { %254 = vst.msk [vmem:[%s564_s4 + $0x8] sm:$0xff] %vm204_vm1, %v183_v41  ;;  %231 = vrot.lane.b32.xlu1 %v130_v38, %s340_s14 }
 0x10a   :  { %v133_v42 = vpop.f32.mrf.mxu2 }
 0x10b   :  { %211 = vst.msk [vmem:[%s563_s2 + $0x30] sm:$0xff] %vm204_vm1, %v133_v42  ;;  %v198_v43 = vpop.f32.mrf.mxu3 }
 0x10c   :  { %259 = vst.msk [vmem:[%s564_s4 + $0x30] sm:$0xff] %vm204_vm1, %v198_v43  ;;  %v121_v44 = vpop.f32.mrf.mxu0 }
 0x10d   :  { %207 = vst.msk [vmem:[%s563_s2 + $0x10] sm:$0xff] %vm204_vm1, %v121_v44  ;;  %v186_v45 = vpop.f32.mrf.mxu1  ;;  %271 = vrot.lane.b32.xlu2 %v183_v41, %s340_s14 }
 0x10e   :  { %255 = vst.msk [vmem:[%s564_s4 + $0x10] sm:$0xff] %vm204_vm1, %v186_v45  ;;  %225 = vrot.lane.b32.xlu1 %v121_v44, %s340_s14  ;;  %273 = vrot.lane.b32.xlu0 %v186_v45, %s340_s14 }
 0x112   :  { %v136_v46 = vpop.f32.mrf.mxu2 }
 0x113   :  { %212 = vst.msk [vmem:[%s563_s2 + $0x38] sm:$0xff] %vm204_vm1, %v136_v46  ;;  %v201_v47 = vpop.f32.mrf.mxu3 }
 0x114   :  { %v124_v48 = vpop.f32.mrf.mxu0  ;;  %260 = vst.msk [vmem:[%s564_s4 + $0x38] sm:$0xff] %vm204_vm1, %v201_v47 }
 0x115   :  { %208 = vst.msk [vmem:[%s563_s2 + $0x18] sm:$0xff] %vm204_vm1, %v124_v48  ;;  %v189_v49 = vpop.f32.mrf.mxu1  ;;  %233 = vrot.lane.b32.xlu2 %v133_v42, %s340_s14 }
 0x116   :  { %256 = vst.msk [vmem:[%s564_s4 + $0x18] sm:$0xff] %vm204_vm1, %v189_v49  ;;  %275 = vrot.lane.b32.xlu1 %v189_v49, %s340_s14  ;;  %235 = vrot.lane.b32.xlu0 %v136_v46, %s340_s14 }
 0x11d   :  { %227 = vrot.lane.b32.xlu2 %v124_v48, %s340_s14 }
 0x11e   :  { %281 = vrot.lane.b32.xlu1 %v198_v43, %s340_s14  ;;  %279 = vrot.lane.b32.xlu0 %v195_v39, %s340_s14 }
 0x125   :  { %283 = vrot.lane.b32.xlu2 %v201_v47, %s340_s14 }
 0x157   :  { %v222_v50 = vpop.permute.xlu2 %221 }
 0x158   :  { %245 = vst.msk [vmem:[%s565_s3] sm:$0xff] %vm204_vm1, %v222_v50 }
 0x15f   :  { %v278_v51 = vpop.permute.xlu2 %277 }
 0x160   :  { %297 = vst.msk [vmem:[%s566_s5 + $0x20] sm:$0xff] %vm204_vm1, %v278_v51 }
 0x167   :  { %v272_v52 = vpop.permute.xlu2 %271 }
 0x168   :  { %294 = vst.msk [vmem:[%s566_s5 + $0x8] sm:$0xff] %vm204_vm1, %v272_v52 }
 0x16d   :  { %v230_v53 = vpop.permute.xlu0 %229 }
 0x16e   :  { %249 = vst.msk [vmem:[%s565_s3 + $0x20] sm:$0xff] %vm204_vm1, %v230_v53 }
 0x16f   :  { %v234_v54 = vpop.permute.xlu2 %233 }
 0x170   :  { %v270_v55 = vpop.permute.xlu1 %269  ;;  %251 = vst.msk [vmem:[%s565_s3 + $0x30] sm:$0xff] %vm204_vm1, %v234_v54 }
 0x171   :  { %293 = vst.msk [vmem:[%s566_s5] sm:$0xff] %vm204_vm1, %v270_v55 }
 0x177   :  { %v228_v56 = vpop.permute.xlu2 %227  ;;  %v224_v57 = vpop.permute.xlu0 %223 }
 0x178   :  { %v232_v58 = vpop.permute.xlu1 %231  ;;  %248 = vst.msk [vmem:[%s565_s3 + $0x18] sm:$0xff] %vm204_vm1, %v228_v56 }
 0x179   :  { %250 = vst.msk [vmem:[%s565_s3 + $0x28] sm:$0xff] %vm204_vm1, %v232_v58 }
 0x17a   :  { %246 = vst.msk [vmem:[%s565_s3 + $0x8] sm:$0xff] %vm204_vm1, %v224_v57 }
 0x17f   :  { %v284_v59 = vpop.permute.xlu2 %283 }
 0x180   :  { %v226_v60 = vpop.permute.xlu1 %225  ;;  %300 = vst.msk [vmem:[%s566_s5 + $0x38] sm:$0xff] %vm204_vm1, %v284_v59  ;;  %v274_v61 = vpop.permute.xlu0 %273 }
 0x181   :  { %247 = vst.msk [vmem:[%s565_s3 + $0x10] sm:$0xff] %vm204_vm1, %v226_v60 }
 0x182   :  { %295 = vst.msk [vmem:[%s566_s5 + $0x10] sm:$0xff] %vm204_vm1, %v274_v61 }
 0x188   :  { %v276_v62 = vpop.permute.xlu1 %275  ;;  %v236_v63 = vpop.permute.xlu0 %235 }
 0x189   :  { %296 = vst.msk [vmem:[%s566_s5 + $0x18] sm:$0xff] %vm204_vm1, %v276_v62 }
 0x18a   :  { %252 = vst.msk [vmem:[%s565_s3 + $0x38] sm:$0xff] %vm204_vm1, %v236_v63 }
 0x190   :  { %v282_v0 = vpop.permute.xlu1 %281  ;;  %v280_v1 = vpop.permute.xlu0 %279 }
 0x191   :  { %299 = vst.msk [vmem:[%s566_s5 + $0x30] sm:$0xff] %vm204_vm1, %v282_v0 }
 0x192   :  { %298 = vst.msk [vmem:[%s566_s5 + $0x28] sm:$0xff] %vm204_vm1, %v280_v1 }

</bundles_post_ra>
